<compile_context>
chip_gen: v6e
topology: v6e:2x2x1
jax: 0.10.0
libtpu: 0.0.40
codegen_flags: <defaults>
</compile_context>

<pallas_src>
import math

import jax
import jax.numpy as jnp
from jax.experimental import pallas as pl
from jax.experimental.pallas import tpu as pltpu


_VMEM_TABLE_BYTES = 8 * 1024 * 1024    # tables up to 8 MiB stay resident in VMEM
_MAX_BLOCK_TOKENS = 256                # tokens gathered per grid step (multiple of 8)
_DMA_RING_SLOTS = 16                   # outstanding row DMAs in the HBM path
_VMEM_LIMIT_BYTES = 48 * 1024 * 1024   # < v7x 64 MiB physical, > v5e 16 MiB default


def _round_up(x: int, m: int) -> int:
    return ((x + m - 1) // m) * m


def _embed_vmem_kernel(ids_ref, w_ref, out_ref):
    """Small-table path: whole [V, E] table resident in VMEM.

    ids_ref: scalar-prefetched flat token ids in SMEM, [n_pad] int32.
    w_ref:   full [V, E] table (constant block index -> stays resident).
    out_ref: dense [T, E] output tile for this grid step.
    """
    i = pl.program_id(0)
    tokens = out_ref.shape[0]
    vocab = w_ref.shape[0]
    base = i * tokens
    # `tokens` is a small compile-time constant (<= 256): static unroll.
    for t in range(tokens):
        row = ids_ref[base + t] % vocab            # torch.remainder semantics
        out_ref[pl.ds(t, 1), :] = w_ref[pl.ds(row, 1), :]


def _embed_hbm_kernel(ids_ref, w_hbm, out_ref, ring, sems):
    """Large-table path: table stays in HBM; per-row DMAs via a semaphore ring.

    ids_ref: scalar-prefetched flat token ids in SMEM, [n_pad] int32.
    w_hbm:   [V, E] table left in HBM (memory_space=pl.ANY).
    out_ref: dense [T, E] output tile (streamed back to HBM by the pipeline).
    ring:    VMEM [n_slots, 1, E] staging slots.
    sems:    DMA semaphores, one per ring slot.
    """
    i = pl.program_id(0)
    tokens = out_ref.shape[0]
    vocab = w_hbm.shape[0]
    n_slots = ring.shape[0]
    base = i * tokens

    def issue(t):
        slot = t % n_slots
        row = ids_ref[base + t] % vocab            # torch.remainder semantics
        pltpu.make_async_copy(
            w_hbm.at[pl.ds(row, 1), :], ring.at[slot], sems.at[slot]
        ).start()

    # Prime the ring with up to n_slots outstanding row DMAs.
    @pl.loop(0, min(n_slots, tokens))
    def _(t):
        issue(t)

    # Drain: wait row t, copy it into the dense output tile, refill slot with
    # row t + n_slots.  Every issued DMA is waited within this grid step.
    @pl.loop(0, tokens)
    def _(t):
        slot = t % n_slots
        pltpu.make_async_copy(
            w_hbm.at[pl.ds(0, 1), :], ring.at[slot], sems.at[slot]
        ).wait()
        out_ref[pl.ds(t, 1), :] = ring[slot]

        @pl.when(t + n_slots < tokens)
        def _():
            issue(t + n_slots)


def parallel_embedding_forward(
    input_ids: jax.Array,
    weight: jax.Array,
    *,
    block_tokens: int | None = None,
    force_hbm_path: bool = False,
) -> jax.Array:
    """Pallas implementation of ParallelEmbedding.forward (world_size=1, quant=False).

    input_ids: int array of any leading shape (e.g. [B, S]).
    weight:    float array [V, E].
    returns:   float array [..., E] with weight's dtype.
    """
    lead_shape = input_ids.shape
    V, E = weight.shape
    N = math.prod(lead_shape) if lead_shape else 1

    # Note: int64 ids beyond 2**31 would be truncated by this cast.
    flat_ids = input_ids.reshape(N).astype(jnp.int32)

    if block_tokens is None:
        block_tokens = min(_MAX_BLOCK_TOKENS, _round_up(N, 8))
    T = max(8, _round_up(block_tokens, 8))        # sublane-dense token tile
    n_pad = _round_up(N, T)
    if n_pad != N:
        flat_ids = jnp.pad(flat_ids, (0, n_pad - N))
    num_tiles = n_pad // T

    out_spec = pl.BlockSpec((T, E), lambda i, ids: (i, 0))
    compiler_params = pltpu.CompilerParams(
        dimension_semantics=("parallel",),
        vmem_limit_bytes=_VMEM_LIMIT_BYTES,
    )

    table_bytes = V * E * weight.dtype.itemsize
    use_vmem_table = (table_bytes <= _VMEM_TABLE_BYTES) and not force_hbm_path

    if use_vmem_table:
        grid_spec = pltpu.PrefetchScalarGridSpec(
            num_scalar_prefetch=1,                 # flat ids land in SMEM
            grid=(num_tiles,),
            in_specs=[
                # Full table as one block with a constant index map: fetched
                # into VMEM once and kept resident across the whole grid.
                pl.BlockSpec((V, E), lambda i, ids: (0, 0)),
            ],
            out_specs=out_spec,
        )
        kernel = _embed_vmem_kernel
    else:
        n_slots = min(_DMA_RING_SLOTS, T)
        grid_spec = pltpu.PrefetchScalarGridSpec(
            num_scalar_prefetch=1,
            grid=(num_tiles,),
            in_specs=[pl.BlockSpec(memory_space=pl.ANY)],   # table stays in HBM
            out_specs=out_spec,
            scratch_shapes=[
                pltpu.VMEM((n_slots, 1, E), weight.dtype),  # DMA ring slots
                pltpu.SemaphoreType.DMA((n_slots,)),
            ],
        )
        kernel = _embed_hbm_kernel

    out = pl.pallas_call(
        kernel,
        out_shape=jax.ShapeDtypeStruct((n_pad, E), weight.dtype),
        grid_spec=grid_spec,
        compiler_params=compiler_params,
    )(flat_ids, weight)

    if n_pad != N:
        out = out[:N]
    return out.reshape(*lead_shape, E)


def make_parallel_embedding_params(num_embeddings: int, embedding_dim: int, key):
    """xavier_normal_ init of the [V, E] table (world_size=1 => full E per shard)."""
    std = (2.0 / (num_embeddings + embedding_dim)) ** 0.5
    return std * jax.random.normal(
        key, (num_embeddings, embedding_dim), dtype=jnp.float32
    )


if __name__ == "__main__":
    # Small shapes consistent with the module (vocab x hidden table, [B, S] ids).
    num_embeddings = 64     # vocabulary size
    embedding_dim = 128     # hidden size (lane-dense last dim)
    batch, seq = 2, 8

    key = jax.random.PRNGKey(0)
    k_w, k_ids = jax.random.split(key)

    weight = make_parallel_embedding_params(num_embeddings, embedding_dim, k_w)
    input_ids = jax.random.randint(
        k_ids, (batch, seq), minval=0, maxval=num_embeddings, dtype=jnp.int32
    )

    ref = jnp.take(weight, input_ids, axis=0)      # F.embedding == row gather

    # Path 1: small-table VMEM-resident gather (what these shapes dispatch to).
    out_vmem = jax.block_until_ready(parallel_embedding_forward(input_ids, weight))
    assert out_vmem.shape == (batch, seq, embedding_dim)
    assert jnp.allclose(out_vmem, ref), "VMEM-path embedding mismatch vs reference"

    # Path 2: large-vocab manual-DMA path, forced here to validate it on-chip.
    out_hbm = jax.block_until_ready(
        parallel_embedding_forward(input_ids, weight, force_hbm_path=True)
    )
    assert jnp.allclose(out_hbm, ref), "HBM-path embedding mismatch vs reference"

    # TODO(synk): quant=True path (int8 weight * per-row weight_scaler) not
    # implemented; module default quant=False is what is reproduced here.
    print("KERNEL_OK")
</pallas_src>

<mosaic_0001>
module attributes {stable_mosaic.version = 11 : i64} {
  func.func @_embed_vmem_kernel(%arg0: i32, %arg1: memref<16xi32, #tpu.memory_space<smem>>, %arg2: memref<64x128xf32, #tpu.memory_space<vmem>>, %arg3: memref<16x128xf32, #tpu.memory_space<vmem>>) attributes {dimension_semantics = [#tpu.dimension_semantics<parallel>], iteration_bounds = array<i64: 1>, scalar_prefetch = 1 : i64, scratch_operands = 0 : i64, tpu.core_type = #tpu.core_type<tc>, window_params = [{pipeline_mode = #tpu.pipeline_mode<synchronous>, transform_indices = @transform_0, window_bounds = array<i64: 64, 128>}, {transform_indices = @transform_1, window_bounds = array<i64: 16, 128>}]} {
    %c16_i32 = arith.constant 16 : i32
    %0 = arith.muli %arg0, %c16_i32 : i32
    %c0_i32 = arith.constant 0 : i32
    %1 = arith.addi %0, %c0_i32 : i32
    %2 = arith.index_cast %1 : i32 to index
    %3 = memref.load %arg1[%2] : memref<16xi32, #tpu.memory_space<smem>>
    %c64_i32 = arith.constant 64 : i32
    %c0_i32_0 = arith.constant 0 : i32
    %4 = arith.cmpi eq, %c64_i32, %c0_i32_0 : i32
    %c1_i32 = arith.constant 1 : i32
    %5 = arith.select %4, %c1_i32, %c64_i32 : i32
    %6 = arith.remsi %3, %5 : i32
    %c0_i32_1 = arith.constant 0 : i32
    %7 = arith.cmpi ne, %6, %c0_i32_1 : i32
    %c0_i32_2 = arith.constant 0 : i32
    %8 = arith.cmpi slt, %6, %c0_i32_2 : i32
    %c0_i32_3 = arith.constant 0 : i32
    %9 = arith.cmpi slt, %5, %c0_i32_3 : i32
    %10 = arith.xori %8, %9 : i1
    %11 = arith.andi %10, %7 : i1
    %12 = arith.addi %6, %5 : i32
    %13 = arith.select %11, %12, %6 : i32
    %14 = arith.index_cast %13 : i32 to index
    %c0 = arith.constant 0 : index
    %15 = vector.load %arg2[%14, %c0] : memref<64x128xf32, #tpu.memory_space<vmem>>, vector<1x128xf32>
    %c0_4 = arith.constant 0 : index
    %c0_5 = arith.constant 0 : index
    %16 = vector.load %arg3[%c0_4, %c0_5] : memref<16x128xf32, #tpu.memory_space<vmem>>, vector<1x128xf32>
    tpu.vector_store %arg3[%c0_4, %c0_5], %15 {strides = array<i32>} : memref<16x128xf32, #tpu.memory_space<vmem>>, vector<1x128xf32>,
    %c1_i32_6 = arith.constant 1 : i32
    %17 = arith.addi %0, %c1_i32_6 : i32
    %18 = arith.index_cast %17 : i32 to index
    %19 = memref.load %arg1[%18] : memref<16xi32, #tpu.memory_space<smem>>
    %c64_i32_7 = arith.constant 64 : i32
    %c0_i32_8 = arith.constant 0 : i32
    %20 = arith.cmpi eq, %c64_i32_7, %c0_i32_8 : i32
    %c1_i32_9 = arith.constant 1 : i32
    %21 = arith.select %20, %c1_i32_9, %c64_i32_7 : i32
    %22 = arith.remsi %19, %21 : i32
    %c0_i32_10 = arith.constant 0 : i32
    %23 = arith.cmpi ne, %22, %c0_i32_10 : i32
    %c0_i32_11 = arith.constant 0 : i32
    %24 = arith.cmpi slt, %22, %c0_i32_11 : i32
    %c0_i32_12 = arith.constant 0 : i32
    %25 = arith.cmpi slt, %21, %c0_i32_12 : i32
    %26 = arith.xori %24, %25 : i1
    %27 = arith.andi %26, %23 : i1
    %28 = arith.addi %22, %21 : i32
    %29 = arith.select %27, %28, %22 : i32
    %30 = arith.index_cast %29 : i32 to index
    %c0_13 = arith.constant 0 : index
    %31 = vector.load %arg2[%30, %c0_13] : memref<64x128xf32, #tpu.memory_space<vmem>>, vector<1x128xf32>
    %c1 = arith.constant 1 : index
    %c0_14 = arith.constant 0 : index
    %32 = vector.load %arg3[%c1, %c0_14] : memref<16x128xf32, #tpu.memory_space<vmem>>, vector<1x128xf32>
    tpu.vector_store %arg3[%c1, %c0_14], %31 {strides = array<i32>} : memref<16x128xf32, #tpu.memory_space<vmem>>, vector<1x128xf32>,
    %c2_i32 = arith.constant 2 : i32
    %33 = arith.addi %0, %c2_i32 : i32
    %34 = arith.index_cast %33 : i32 to index
    %35 = memref.load %arg1[%34] : memref<16xi32, #tpu.memory_space<smem>>
    %c64_i32_15 = arith.constant 64 : i32
    %c0_i32_16 = arith.constant 0 : i32
    %36 = arith.cmpi eq, %c64_i32_15, %c0_i32_16 : i32
    %c1_i32_17 = arith.constant 1 : i32
    %37 = arith.select %36, %c1_i32_17, %c64_i32_15 : i32
    %38 = arith.remsi %35, %37 : i32
    %c0_i32_18 = arith.constant 0 : i32
    %39 = arith.cmpi ne, %38, %c0_i32_18 : i32
    %c0_i32_19 = arith.constant 0 : i32
    %40 = arith.cmpi slt, %38, %c0_i32_19 : i32
    %c0_i32_20 = arith.constant 0 : i32
    %41 = arith.cmpi slt, %37, %c0_i32_20 : i32
    %42 = arith.xori %40, %41 : i1
    %43 = arith.andi %42, %39 : i1
    %44 = arith.addi %38, %37 : i32
    %45 = arith.select %43, %44, %38 : i32
    %46 = arith.index_cast %45 : i32 to index
    %c0_21 = arith.constant 0 : index
    %47 = vector.load %arg2[%46, %c0_21] : memref<64x128xf32, #tpu.memory_space<vmem>>, vector<1x128xf32>
    %c2 = arith.constant 2 : index
    %c0_22 = arith.constant 0 : index
    %48 = vector.load %arg3[%c2, %c0_22] : memref<16x128xf32, #tpu.memory_space<vmem>>, vector<1x128xf32>
    tpu.vector_store %arg3[%c2, %c0_22], %47 {strides = array<i32>} : memref<16x128xf32, #tpu.memory_space<vmem>>, vector<1x128xf32>,
    %c3_i32 = arith.constant 3 : i32
    %49 = arith.addi %0, %c3_i32 : i32
    %50 = arith.index_cast %49 : i32 to index
    %51 = memref.load %arg1[%50] : memref<16xi32, #tpu.memory_space<smem>>
    %c64_i32_23 = arith.constant 64 : i32
    %c0_i32_24 = arith.constant 0 : i32
    %52 = arith.cmpi eq, %c64_i32_23, %c0_i32_24 : i32
    %c1_i32_25 = arith.constant 1 : i32
    %53 = arith.select %52, %c1_i32_25, %c64_i32_23 : i32
    %54 = arith.remsi %51, %53 : i32
    %c0_i32_26 = arith.constant 0 : i32
    %55 = arith.cmpi ne, %54, %c0_i32_26 : i32
    %c0_i32_27 = arith.constant 0 : i32
    %56 = arith.cmpi slt, %54, %c0_i32_27 : i32
    %c0_i32_28 = arith.constant 0 : i32
    %57 = arith.cmpi slt, %53, %c0_i32_28 : i32
    %58 = arith.xori %56, %57 : i1
    %59 = arith.andi %58, %55 : i1
    %60 = arith.addi %54, %53 : i32
    %61 = arith.select %59, %60, %54 : i32
    %62 = arith.index_cast %61 : i32 to index
    %c0_29 = arith.constant 0 : index
    %63 = vector.load %arg2[%62, %c0_29] : memref<64x128xf32, #tpu.memory_space<vmem>>, vector<1x128xf32>
    %c3 = arith.constant 3 : index
    %c0_30 = arith.constant 0 : index
    %64 = vector.load %arg3[%c3, %c0_30] : memref<16x128xf32, #tpu.memory_space<vmem>>, vector<1x128xf32>
    tpu.vector_store %arg3[%c3, %c0_30], %63 {strides = array<i32>} : memref<16x128xf32, #tpu.memory_space<vmem>>, vector<1x128xf32>,
    %c4_i32 = arith.constant 4 : i32
    %65 = arith.addi %0, %c4_i32 : i32
    %66 = arith.index_cast %65 : i32 to index
    %67 = memref.load %arg1[%66] : memref<16xi32, #tpu.memory_space<smem>>
    %c64_i32_31 = arith.constant 64 : i32
    %c0_i32_32 = arith.constant 0 : i32
    %68 = arith.cmpi eq, %c64_i32_31, %c0_i32_32 : i32
    %c1_i32_33 = arith.constant 1 : i32
    %69 = arith.select %68, %c1_i32_33, %c64_i32_31 : i32
    %70 = arith.remsi %67, %69 : i32
    %c0_i32_34 = arith.constant 0 : i32
    %71 = arith.cmpi ne, %70, %c0_i32_34 : i32
    %c0_i32_35 = arith.constant 0 : i32
    %72 = arith.cmpi slt, %70, %c0_i32_35 : i32
    %c0_i32_36 = arith.constant 0 : i32
    %73 = arith.cmpi slt, %69, %c0_i32_36 : i32
    %74 = arith.xori %72, %73 : i1
    %75 = arith.andi %74, %71 : i1
    %76 = arith.addi %70, %69 : i32
    %77 = arith.select %75, %76, %70 : i32
    %78 = arith.index_cast %77 : i32 to index
    %c0_37 = arith.constant 0 : index
    %79 = vector.load %arg2[%78, %c0_37] : memref<64x128xf32, #tpu.memory_space<vmem>>, vector<1x128xf32>
    %c4 = arith.constant 4 : index
    %c0_38 = arith.constant 0 : index
    %80 = vector.load %arg3[%c4, %c0_38] : memref<16x128xf32, #tpu.memory_space<vmem>>, vector<1x128xf32>
    tpu.vector_store %arg3[%c4, %c0_38], %79 {strides = array<i32>} : memref<16x128xf32, #tpu.memory_space<vmem>>, vector<1x128xf32>,
    %c5_i32 = arith.constant 5 : i32
    %81 = arith.addi %0, %c5_i32 : i32
    %82 = arith.index_cast %81 : i32 to index
    %83 = memref.load %arg1[%82] : memref<16xi32, #tpu.memory_space<smem>>
    %c64_i32_39 = arith.constant 64 : i32
    %c0_i32_40 = arith.constant 0 : i32
    %84 = arith.cmpi eq, %c64_i32_39, %c0_i32_40 : i32
    %c1_i32_41 = arith.constant 1 : i32
    %85 = arith.select %84, %c1_i32_41, %c64_i32_39 : i32
    %86 = arith.remsi %83, %85 : i32
    %c0_i32_42 = arith.constant 0 : i32
    %87 = arith.cmpi ne, %86, %c0_i32_42 : i32
    %c0_i32_43 = arith.constant 0 : i32
    %88 = arith.cmpi slt, %86, %c0_i32_43 : i32
    %c0_i32_44 = arith.constant 0 : i32
    %89 = arith.cmpi slt, %85, %c0_i32_44 : i32
    %90 = arith.xori %88, %89 : i1
    %91 = arith.andi %90, %87 : i1
    %92 = arith.addi %86, %85 : i32
    %93 = arith.select %91, %92, %86 : i32
    %94 = arith.index_cast %93 : i32 to index
    %c0_45 = arith.constant 0 : index
    %95 = vector.load %arg2[%94, %c0_45] : memref<64x128xf32, #tpu.memory_space<vmem>>, vector<1x128xf32>
    %c5 = arith.constant 5 : index
    %c0_46 = arith.constant 0 : index
    %96 = vector.load %arg3[%c5, %c0_46] : memref<16x128xf32, #tpu.memory_space<vmem>>, vector<1x128xf32>
    tpu.vector_store %arg3[%c5, %c0_46], %95 {strides = array<i32>} : memref<16x128xf32, #tpu.memory_space<vmem>>, vector<1x128xf32>,
    %c6_i32 = arith.constant 6 : i32
    %97 = arith.addi %0, %c6_i32 : i32
    %98 = arith.index_cast %97 : i32 to index
    %99 = memref.load %arg1[%98] : memref<16xi32, #tpu.memory_space<smem>>
    %c64_i32_47 = arith.constant 64 : i32
    %c0_i32_48 = arith.constant 0 : i32
    %100 = arith.cmpi eq, %c64_i32_47, %c0_i32_48 : i32
    %c1_i32_49 = arith.constant 1 : i32
    %101 = arith.select %100, %c1_i32_49, %c64_i32_47 : i32
    %102 = arith.remsi %99, %101 : i32
    %c0_i32_50 = arith.constant 0 : i32
    %103 = arith.cmpi ne, %102, %c0_i32_50 : i32
    %c0_i32_51 = arith.constant 0 : i32
    %104 = arith.cmpi slt, %102, %c0_i32_51 : i32
    %c0_i32_52 = arith.constant 0 : i32
    %105 = arith.cmpi slt, %101, %c0_i32_52 : i32
    %106 = arith.xori %104, %105 : i1
    %107 = arith.andi %106, %103 : i1
    %108 = arith.addi %102, %101 : i32
    %109 = arith.select %107, %108, %102 : i32
    %110 = arith.index_cast %109 : i32 to index
    %c0_53 = arith.constant 0 : index
    %111 = vector.load %arg2[%110, %c0_53] : memref<64x128xf32, #tpu.memory_space<vmem>>, vector<1x128xf32>
    %c6 = arith.constant 6 : index
    %c0_54 = arith.constant 0 : index
    %112 = vector.load %arg3[%c6, %c0_54] : memref<16x128xf32, #tpu.memory_space<vmem>>, vector<1x128xf32>
    tpu.vector_store %arg3[%c6, %c0_54], %111 {strides = array<i32>} : memref<16x128xf32, #tpu.memory_space<vmem>>, vector<1x128xf32>,
    %c7_i32 = arith.constant 7 : i32
    %113 = arith.addi %0, %c7_i32 : i32
    %114 = arith.index_cast %113 : i32 to index
    %115 = memref.load %arg1[%114] : memref<16xi32, #tpu.memory_space<smem>>
    %c64_i32_55 = arith.constant 64 : i32
    %c0_i32_56 = arith.constant 0 : i32
    %116 = arith.cmpi eq, %c64_i32_55, %c0_i32_56 : i32
    %c1_i32_57 = arith.constant 1 : i32
    %117 = arith.select %116, %c1_i32_57, %c64_i32_55 : i32
    %118 = arith.remsi %115, %117 : i32
    %c0_i32_58 = arith.constant 0 : i32
    %119 = arith.cmpi ne, %118, %c0_i32_58 : i32
    %c0_i32_59 = arith.constant 0 : i32
    %120 = arith.cmpi slt, %118, %c0_i32_59 : i32
    %c0_i32_60 = arith.constant 0 : i32
    %121 = arith.cmpi slt, %117, %c0_i32_60 : i32
    %122 = arith.xori %120, %121 : i1
    %123 = arith.andi %122, %119 : i1
    %124 = arith.addi %118, %117 : i32
    %125 = arith.select %123, %124, %118 : i32
    %126 = arith.index_cast %125 : i32 to index
    %c0_61 = arith.constant 0 : index
    %127 = vector.load %arg2[%126, %c0_61] : memref<64x128xf32, #tpu.memory_space<vmem>>, vector<1x128xf32>
    %c7 = arith.constant 7 : index
    %c0_62 = arith.constant 0 : index
    %128 = vector.load %arg3[%c7, %c0_62] : memref<16x128xf32, #tpu.memory_space<vmem>>, vector<1x128xf32>
    tpu.vector_store %arg3[%c7, %c0_62], %127 {strides = array<i32>} : memref<16x128xf32, #tpu.memory_space<vmem>>, vector<1x128xf32>,
    %c8_i32 = arith.constant 8 : i32
    %129 = arith.addi %0, %c8_i32 : i32
    %130 = arith.index_cast %129 : i32 to index
    %131 = memref.load %arg1[%130] : memref<16xi32, #tpu.memory_space<smem>>
    %c64_i32_63 = arith.constant 64 : i32
    %c0_i32_64 = arith.constant 0 : i32
    %132 = arith.cmpi eq, %c64_i32_63, %c0_i32_64 : i32
    %c1_i32_65 = arith.constant 1 : i32
    %133 = arith.select %132, %c1_i32_65, %c64_i32_63 : i32
    %134 = arith.remsi %131, %133 : i32
    %c0_i32_66 = arith.constant 0 : i32
    %135 = arith.cmpi ne, %134, %c0_i32_66 : i32
    %c0_i32_67 = arith.constant 0 : i32
    %136 = arith.cmpi slt, %134, %c0_i32_67 : i32
    %c0_i32_68 = arith.constant 0 : i32
    %137 = arith.cmpi slt, %133, %c0_i32_68 : i32
    %138 = arith.xori %136, %137 : i1
    %139 = arith.andi %138, %135 : i1
    %140 = arith.addi %134, %133 : i32
    %141 = arith.select %139, %140, %134 : i32
    %142 = arith.index_cast %141 : i32 to index
    %c0_69 = arith.constant 0 : index
    %143 = vector.load %arg2[%142, %c0_69] : memref<64x128xf32, #tpu.memory_space<vmem>>, vector<1x128xf32>
    %c8 = arith.constant 8 : index
    %c0_70 = arith.constant 0 : index
    %144 = vector.load %arg3[%c8, %c0_70] : memref<16x128xf32, #tpu.memory_space<vmem>>, vector<1x128xf32>
    tpu.vector_store %arg3[%c8, %c0_70], %143 {strides = array<i32>} : memref<16x128xf32, #tpu.memory_space<vmem>>, vector<1x128xf32>,
    %c9_i32 = arith.constant 9 : i32
    %145 = arith.addi %0, %c9_i32 : i32
    %146 = arith.index_cast %145 : i32 to index
    %147 = memref.load %arg1[%146] : memref<16xi32, #tpu.memory_space<smem>>
    %c64_i32_71 = arith.constant 64 : i32
    %c0_i32_72 = arith.constant 0 : i32
    %148 = arith.cmpi eq, %c64_i32_71, %c0_i32_72 : i32
    %c1_i32_73 = arith.constant 1 : i32
    %149 = arith.select %148, %c1_i32_73, %c64_i32_71 : i32
    %150 = arith.remsi %147, %149 : i32
    %c0_i32_74 = arith.constant 0 : i32
    %151 = arith.cmpi ne, %150, %c0_i32_74 : i32
    %c0_i32_75 = arith.constant 0 : i32
    %152 = arith.cmpi slt, %150, %c0_i32_75 : i32
    %c0_i32_76 = arith.constant 0 : i32
    %153 = arith.cmpi slt, %149, %c0_i32_76 : i32
    %154 = arith.xori %152, %153 : i1
    %155 = arith.andi %154, %151 : i1
    %156 = arith.addi %150, %149 : i32
    %157 = arith.select %155, %156, %150 : i32
    %158 = arith.index_cast %157 : i32 to index
    %c0_77 = arith.constant 0 : index
    %159 = vector.load %arg2[%158, %c0_77] : memref<64x128xf32, #tpu.memory_space<vmem>>, vector<1x128xf32>
    %c9 = arith.constant 9 : index
    %c0_78 = arith.constant 0 : index
    %160 = vector.load %arg3[%c9, %c0_78] : memref<16x128xf32, #tpu.memory_space<vmem>>, vector<1x128xf32>
    tpu.vector_store %arg3[%c9, %c0_78], %159 {strides = array<i32>} : memref<16x128xf32, #tpu.memory_space<vmem>>, vector<1x128xf32>,
    %c10_i32 = arith.constant 10 : i32
    %161 = arith.addi %0, %c10_i32 : i32
    %162 = arith.index_cast %161 : i32 to index
    %163 = memref.load %arg1[%162] : memref<16xi32, #tpu.memory_space<smem>>
    %c64_i32_79 = arith.constant 64 : i32
    %c0_i32_80 = arith.constant 0 : i32
    %164 = arith.cmpi eq, %c64_i32_79, %c0_i32_80 : i32
    %c1_i32_81 = arith.constant 1 : i32
    %165 = arith.select %164, %c1_i32_81, %c64_i32_79 : i32
    %166 = arith.remsi %163, %165 : i32
    %c0_i32_82 = arith.constant 0 : i32
    %167 = arith.cmpi ne, %166, %c0_i32_82 : i32
    %c0_i32_83 = arith.constant 0 : i32
    %168 = arith.cmpi slt, %166, %c0_i32_83 : i32
    %c0_i32_84 = arith.constant 0 : i32
    %169 = arith.cmpi slt, %165, %c0_i32_84 : i32
    %170 = arith.xori %168, %169 : i1
    %171 = arith.andi %170, %167 : i1
    %172 = arith.addi %166, %165 : i32
    %173 = arith.select %171, %172, %166 : i32
    %174 = arith.index_cast %173 : i32 to index
    %c0_85 = arith.constant 0 : index
    %175 = vector.load %arg2[%174, %c0_85] : memref<64x128xf32, #tpu.memory_space<vmem>>, vector<1x128xf32>
    %c10 = arith.constant 10 : index
    %c0_86 = arith.constant 0 : index
    %176 = vector.load %arg3[%c10, %c0_86] : memref<16x128xf32, #tpu.memory_space<vmem>>, vector<1x128xf32>
    tpu.vector_store %arg3[%c10, %c0_86], %175 {strides = array<i32>} : memref<16x128xf32, #tpu.memory_space<vmem>>, vector<1x128xf32>,
    %c11_i32 = arith.constant 11 : i32
    %177 = arith.addi %0, %c11_i32 : i32
    %178 = arith.index_cast %177 : i32 to index
    %179 = memref.load %arg1[%178] : memref<16xi32, #tpu.memory_space<smem>>
    %c64_i32_87 = arith.constant 64 : i32
    %c0_i32_88 = arith.constant 0 : i32
    %180 = arith.cmpi eq, %c64_i32_87, %c0_i32_88 : i32
    %c1_i32_89 = arith.constant 1 : i32
    %181 = arith.select %180, %c1_i32_89, %c64_i32_87 : i32
    %182 = arith.remsi %179, %181 : i32
    %c0_i32_90 = arith.constant 0 : i32
    %183 = arith.cmpi ne, %182, %c0_i32_90 : i32
    %c0_i32_91 = arith.constant 0 : i32
    %184 = arith.cmpi slt, %182, %c0_i32_91 : i32
    %c0_i32_92 = arith.constant 0 : i32
    %185 = arith.cmpi slt, %181, %c0_i32_92 : i32
    %186 = arith.xori %184, %185 : i1
    %187 = arith.andi %186, %183 : i1
    %188 = arith.addi %182, %181 : i32
    %189 = arith.select %187, %188, %182 : i32
    %190 = arith.index_cast %189 : i32 to index
    %c0_93 = arith.constant 0 : index
    %191 = vector.load %arg2[%190, %c0_93] : memref<64x128xf32, #tpu.memory_space<vmem>>, vector<1x128xf32>
    %c11 = arith.constant 11 : index
    %c0_94 = arith.constant 0 : index
    %192 = vector.load %arg3[%c11, %c0_94] : memref<16x128xf32, #tpu.memory_space<vmem>>, vector<1x128xf32>
    tpu.vector_store %arg3[%c11, %c0_94], %191 {strides = array<i32>} : memref<16x128xf32, #tpu.memory_space<vmem>>, vector<1x128xf32>,
    %c12_i32 = arith.constant 12 : i32
    %193 = arith.addi %0, %c12_i32 : i32
    %194 = arith.index_cast %193 : i32 to index
    %195 = memref.load %arg1[%194] : memref<16xi32, #tpu.memory_space<smem>>
    %c64_i32_95 = arith.constant 64 : i32
    %c0_i32_96 = arith.constant 0 : i32
    %196 = arith.cmpi eq, %c64_i32_95, %c0_i32_96 : i32
    %c1_i32_97 = arith.constant 1 : i32
    %197 = arith.select %196, %c1_i32_97, %c64_i32_95 : i32
    %198 = arith.remsi %195, %197 : i32
    %c0_i32_98 = arith.constant 0 : i32
    %199 = arith.cmpi ne, %198, %c0_i32_98 : i32
    %c0_i32_99 = arith.constant 0 : i32
    %200 = arith.cmpi slt, %198, %c0_i32_99 : i32
    %c0_i32_100 = arith.constant 0 : i32
    %201 = arith.cmpi slt, %197, %c0_i32_100 : i32
    %202 = arith.xori %200, %201 : i1
    %203 = arith.andi %202, %199 : i1
    %204 = arith.addi %198, %197 : i32
    %205 = arith.select %203, %204, %198 : i32
    %206 = arith.index_cast %205 : i32 to index
    %c0_101 = arith.constant 0 : index
    %207 = vector.load %arg2[%206, %c0_101] : memref<64x128xf32, #tpu.memory_space<vmem>>, vector<1x128xf32>
    %c12 = arith.constant 12 : index
    %c0_102 = arith.constant 0 : index
    %208 = vector.load %arg3[%c12, %c0_102] : memref<16x128xf32, #tpu.memory_space<vmem>>, vector<1x128xf32>
    tpu.vector_store %arg3[%c12, %c0_102], %207 {strides = array<i32>} : memref<16x128xf32, #tpu.memory_space<vmem>>, vector<1x128xf32>,
    %c13_i32 = arith.constant 13 : i32
    %209 = arith.addi %0, %c13_i32 : i32
    %210 = arith.index_cast %209 : i32 to index
    %211 = memref.load %arg1[%210] : memref<16xi32, #tpu.memory_space<smem>>
    %c64_i32_103 = arith.constant 64 : i32
    %c0_i32_104 = arith.constant 0 : i32
    %212 = arith.cmpi eq, %c64_i32_103, %c0_i32_104 : i32
    %c1_i32_105 = arith.constant 1 : i32
    %213 = arith.select %212, %c1_i32_105, %c64_i32_103 : i32
    %214 = arith.remsi %211, %213 : i32
    %c0_i32_106 = arith.constant 0 : i32
    %215 = arith.cmpi ne, %214, %c0_i32_106 : i32
    %c0_i32_107 = arith.constant 0 : i32
    %216 = arith.cmpi slt, %214, %c0_i32_107 : i32
    %c0_i32_108 = arith.constant 0 : i32
    %217 = arith.cmpi slt, %213, %c0_i32_108 : i32
    %218 = arith.xori %216, %217 : i1
    %219 = arith.andi %218, %215 : i1
    %220 = arith.addi %214, %213 : i32
    %221 = arith.select %219, %220, %214 : i32
    %222 = arith.index_cast %221 : i32 to index
    %c0_109 = arith.constant 0 : index
    %223 = vector.load %arg2[%222, %c0_109] : memref<64x128xf32, #tpu.memory_space<vmem>>, vector<1x128xf32>
    %c13 = arith.constant 13 : index
    %c0_110 = arith.constant 0 : index
    %224 = vector.load %arg3[%c13, %c0_110] : memref<16x128xf32, #tpu.memory_space<vmem>>, vector<1x128xf32>
    tpu.vector_store %arg3[%c13, %c0_110], %223 {strides = array<i32>} : memref<16x128xf32, #tpu.memory_space<vmem>>, vector<1x128xf32>,
    %c14_i32 = arith.constant 14 : i32
    %225 = arith.addi %0, %c14_i32 : i32
    %226 = arith.index_cast %225 : i32 to index
    %227 = memref.load %arg1[%226] : memref<16xi32, #tpu.memory_space<smem>>
    %c64_i32_111 = arith.constant 64 : i32
    %c0_i32_112 = arith.constant 0 : i32
    %228 = arith.cmpi eq, %c64_i32_111, %c0_i32_112 : i32
    %c1_i32_113 = arith.constant 1 : i32
    %229 = arith.select %228, %c1_i32_113, %c64_i32_111 : i32
    %230 = arith.remsi %227, %229 : i32
    %c0_i32_114 = arith.constant 0 : i32
    %231 = arith.cmpi ne, %230, %c0_i32_114 : i32
    %c0_i32_115 = arith.constant 0 : i32
    %232 = arith.cmpi slt, %230, %c0_i32_115 : i32
    %c0_i32_116 = arith.constant 0 : i32
    %233 = arith.cmpi slt, %229, %c0_i32_116 : i32
    %234 = arith.xori %232, %233 : i1
    %235 = arith.andi %234, %231 : i1
    %236 = arith.addi %230, %229 : i32
    %237 = arith.select %235, %236, %230 : i32
    %238 = arith.index_cast %237 : i32 to index
    %c0_117 = arith.constant 0 : index
    %239 = vector.load %arg2[%238, %c0_117] : memref<64x128xf32, #tpu.memory_space<vmem>>, vector<1x128xf32>
    %c14 = arith.constant 14 : index
    %c0_118 = arith.constant 0 : index
    %240 = vector.load %arg3[%c14, %c0_118] : memref<16x128xf32, #tpu.memory_space<vmem>>, vector<1x128xf32>
    tpu.vector_store %arg3[%c14, %c0_118], %239 {strides = array<i32>} : memref<16x128xf32, #tpu.memory_space<vmem>>, vector<1x128xf32>,
    %c15_i32 = arith.constant 15 : i32
    %241 = arith.addi %0, %c15_i32 : i32
    %242 = arith.index_cast %241 : i32 to index
    %243 = memref.load %arg1[%242] : memref<16xi32, #tpu.memory_space<smem>>
    %c64_i32_119 = arith.constant 64 : i32
    %c0_i32_120 = arith.constant 0 : i32
    %244 = arith.cmpi eq, %c64_i32_119, %c0_i32_120 : i32
    %c1_i32_121 = arith.constant 1 : i32
    %245 = arith.select %244, %c1_i32_121, %c64_i32_119 : i32
    %246 = arith.remsi %243, %245 : i32
    %c0_i32_122 = arith.constant 0 : i32
    %247 = arith.cmpi ne, %246, %c0_i32_122 : i32
    %c0_i32_123 = arith.constant 0 : i32
    %248 = arith.cmpi slt, %246, %c0_i32_123 : i32
    %c0_i32_124 = arith.constant 0 : i32
    %249 = arith.cmpi slt, %245, %c0_i32_124 : i32
    %250 = arith.xori %248, %249 : i1
    %251 = arith.andi %250, %247 : i1
    %252 = arith.addi %246, %245 : i32
    %253 = arith.select %251, %252, %246 : i32
    %254 = arith.index_cast %253 : i32 to index
    %c0_125 = arith.constant 0 : index
    %255 = vector.load %arg2[%254, %c0_125] : memref<64x128xf32, #tpu.memory_space<vmem>>, vector<1x128xf32>
    %c15 = arith.constant 15 : index
    %c0_126 = arith.constant 0 : index
    %256 = vector.load %arg3[%c15, %c0_126] : memref<16x128xf32, #tpu.memory_space<vmem>>, vector<1x128xf32>
    tpu.vector_store %arg3[%c15, %c0_126], %255 {strides = array<i32>} : memref<16x128xf32, #tpu.memory_space<vmem>>, vector<1x128xf32>,
    return
  }
  func.func @transform_0(%arg0: i32, %arg1: memref<16xi32, #tpu.memory_space<smem>>) -> (i32, i32) {
    %c0_i32 = arith.constant 0 : i32
    %c0_i32_0 = arith.constant 0 : i32
    %c0_i32_1 = arith.constant 0 : i32
    return %c0_i32, %c0_i32_0 : i32, i32
  }
  func.func @transform_1(%arg0: i32, %arg1: memref<16xi32, #tpu.memory_space<smem>>) -> (i32, i32) {
    %c0_i32 = arith.constant 0 : i32
    %c0_i32_0 = arith.constant 0 : i32
    return %arg0, %c0_i32 : i32, i32
  }
}

</mosaic_0001>

<bundles_post_ra>
// kernel: tpu_custom_call.1
= control target key start
LH: loop header
LB: loop body
LE: loop exit
PB: predicated region body
PF: predicated region fallthrough
CT: control target
= control target key end

     0   :  { %s455_s9 = smov [#allocation3]   ;;  %s558_s0 = inlined_call_operand.hbm [shape: s32[16], index: 0, kind: input, shape index: {}]   ;;  %s559_s1 = inlined_call_operand.hbm [shape: f32[64,128], index: 1, kind: input, shape index: {}]   ;;  %s560_s2 = inlined_call_operand.hbm [shape: f32[16,128], index: 2, kind: output, shape index: {}]  }
   0x1   :  { %8 = dma.hbm_to_smem %s558_s0, 16, %s455_s9, [#allocation2] }
   0x2   :  { %449 = dma.done.wait [#allocation2], 16 }
   0x3   :  { %450 = vsyncadd [#allocation2], 4294967280 }
   0x4   :  { %10 = sfence }
   0x5   :  { %11 = vsyncpa [#allocation5], 0 }
   0x6   :  { %12 = vsyncpa [#allocation6], 0  ;;  %s456_s12 = smov [#allocation4]  }
   0x7   :  { %s18_s13 = sshll.u32 %s456_s12, 4  ;;  %s19_s13 = int_to_ptr.vmem [resolvable:$true] %s18_s13 }
   0x8   :  { %s417_s14 = scalar_lea.vmem %s19_s13, 1024  ;;  %p422_p1 = scmp.lt.s32.totalorder %s19_s13, %s19_s13 }
   0x9   :  { %p418_p0 = scmp.ne.s32.totalorder %s19_s13, %s417_s14  ;;  %p423_p2 = scmp.lt.s32.totalorder %s417_s14, %s417_s14 }
   0xb   :  { %p424_p3 = por %p423_p2, %p422_p1 }
   0xd   :  { %p425_p4 = pnand %p424_p3, %p418_p0 }
   0xf   :  { %428 = shalt.err (!%p425_p4)
}
  0x10   :  { %s457_s15 = smov 128   ;;  %s458_s16 = smov 8  }
  0x11   :  { %24 = dma.hbm_to_vmem [thread:$0]  %s559_s1, 1024, %s19_s13, [#allocation5], %s457_s15, %s457_s15, %s458_s16  }
  0x12   :  { %451 = dma.done.wait [#allocation5], 1024  }
  0x13   :  { %452 = vsyncadd [#allocation5], 4294966272  ;;  %s29_s18 = sld [smem:[#allocation3]] }
  0x14   :  { %s336_s19 = sld [smem:[#allocation3 + $0x1]] }
  0x15   :  { %s484_s20 = sld [smem:[#allocation3 + $0x2]] }
  0x16   :  { %s486_s21 = sld [smem:[#allocation3 + $0x3]] }
  0x17   :  { %s488_s22 = sld [smem:[#allocation3 + $0x4]] }
  0x18   :  { %s490_s23 = sld [smem:[#allocation3 + $0x5]] }
  0x19   :  { %p30_p5 = scmp.lt.s32.totalorder %s29_s18, 0  ;;  %s31_s24 = ssub.s32 0, %s29_s18 }
  0x1a   :  { %s333_s25 = smin.u32 %s31_s24, %s29_s18  ;;  %p47_p6 = scmp.lt.s32.totalorder %s336_s19, 0 }
  0x1b   :  { %s33_s1 = sand.u32 63, %s333_s25   ;;  %s48_s26 = ssub.s32 0, %s336_s19 }
  0x1c   :  { %s34_s27 = ssub.s32 0, %s33_s1  ;;  %s337_s28 = smin.u32 %s336_s19, %s48_s26 }
  0x1d   :  { %s562_s27 = smov (!%p30_p5, %s34_s27), %s33_s1  ;;  %s50_s29 = sand.u32 63, %s337_s28  }
  0x1e   :  { %p64_p7 = scmp.lt.s32.totalorder %s484_s20, 0  ;;  %p335_p8 = scmp.lt.s32.totalorder %s562_s27, 0 }
  0x1f   :  { %s40_s30 = sadd.s32 64, %s562_s27  ;;  %s51_s3 = ssub.s32 0, %s50_s29 }
  0x20   :  { %s65_s4 = ssub.s32 0, %s484_s20  ;;  %s564_s30 = smov (!%p335_p8, %s40_s30), %s562_s27 }
  0x21   :  { %s566_s3 = smov (!%p47_p6, %s51_s3), %s50_s29  ;;  %s341_s5 = smin.u32 %s484_s20, %s65_s4 }
  0x22   :  { %s42_s6 = scalar_lea.vmem [#allocation4], %s564_s30  ;;  %p339_p9 = scmp.lt.s32.totalorder %s566_s3, 0 }
  0x23   :  { %v43_v0 = vld [vmem:[%s42_s6] sm:$0x1]  ;;  %s57_s7 = sadd.s32 64, %s566_s3  ;;  %s67_s8 = sand.u32 63, %s341_s5  }
  0x24   :  { %44 = vst [vmem:[#allocation7] sm:$0x1] %v43_v0  ;;  %p81_p10 = scmp.lt.s32.totalorder %s486_s21, 0  ;;  %s568_s7 = smov (!%p339_p9, %s57_s7), %s566_s3 }
  0x25   :  { %s68_s9 = ssub.s32 0, %s67_s8  ;;  %s82_s10 = ssub.s32 0, %s486_s21 }
  0x26   :  { %s345_s11 = smin.u32 %s486_s21, %s82_s10  ;;  %s59_s12 = scalar_lea.vmem [#allocation4], %s568_s7 }
  0x27   :  { %v60_v1 = vld [vmem:[%s59_s12] sm:$0x1]  ;;  %s570_s9 = smov (!%p64_p7, %s68_s9), %s67_s8  ;;  %s84_s13 = sand.u32 63, %s345_s11  }
  0x28   :  { %61 = vst [vmem:[#allocation7 + $0x1] sm:$0x1] %v60_v1  ;;  %p98_p11 = scmp.lt.s32.totalorder %s488_s22, 0  ;;  %p343_p12 = scmp.lt.s32.totalorder %s570_s9, 0 }
  0x29   :  { %s74_s14 = sadd.s32 64, %s570_s9  ;;  %s85_s0 = ssub.s32 0, %s84_s13 }
  0x2a   :  { %s99_s17 = ssub.s32 0, %s488_s22  ;;  %s572_s14 = smov (!%p343_p12, %s74_s14), %s570_s9 }
  0x2b   :  { %s574_s0 = smov (!%p81_p10, %s85_s0), %s84_s13  ;;  %s349_s18 = smin.u32 %s488_s22, %s99_s17 }
  0x2c   :  { %s76_s19 = scalar_lea.vmem [#allocation4], %s572_s14  ;;  %p347_p13 = scmp.lt.s32.totalorder %s574_s0, 0 }
  0x2d   :  { %v77_v2 = vld [vmem:[%s76_s19] sm:$0x1]  ;;  %s91_s20 = sadd.s32 64, %s574_s0  ;;  %s101_s24 = sand.u32 63, %s349_s18  }
  0x2e   :  { %78 = vst [vmem:[#allocation7 + $0x2] sm:$0x1] %v77_v2  ;;  %p115_p0 = scmp.lt.s32.totalorder %s490_s23, 0  ;;  %s576_s20 = smov (!%p347_p13, %s91_s20), %s574_s0 }
  0x2f   :  { %s102_s25 = ssub.s32 0, %s101_s24  ;;  %s116_s1 = ssub.s32 0, %s490_s23 }
  0x30   :  { %s353_s26 = smin.u32 %s490_s23, %s116_s1  ;;  %s93_s27 = scalar_lea.vmem [#allocation4], %s576_s20 }
  0x31   :  { %v94_v3 = vld [vmem:[%s93_s27] sm:$0x1]  ;;  %s578_s25 = smov (!%p98_p11, %s102_s25), %s101_s24  ;;  %s118_s21 = sand.u32 63, %s353_s26  }
  0x32   :  { %95 = vst [vmem:[#allocation7 + $0x3] sm:$0x1] %v94_v3  ;;  %s356_s28 = sld [smem:[#allocation3 + $0x6]]  ;;  %p351_p1 = scmp.lt.s32.totalorder %s578_s25, 0 }
  0x33   :  { %s108_s29 = sadd.s32 64, %s578_s25  ;;  %s119_s30 = ssub.s32 0, %s118_s21 }
  0x34   :  { %s510_s3 = sld [smem:[#allocation3 + $0x7]]  ;;  %s580_s29 = smov (!%p351_p1, %s108_s29), %s578_s25 }
  0x35   :  { %s582_s30 = smov (!%p115_p0, %s119_s30), %s118_s21  ;;  %s514_s4 = sld [smem:[#allocation3 + $0x8]] }
  0x36   :  { %s110_s5 = scalar_lea.vmem [#allocation4], %s580_s29  ;;  %p355_p2 = scmp.lt.s32.totalorder %s582_s30, 0 }
  0x37   :  { %v111_v4 = vld [vmem:[%s110_s5] sm:$0x1]  ;;  %s125_s22 = sadd.s32 64, %s582_s30  ;;  %s368_s24 = sld [smem:[#allocation3 + $0x9]] }
  0x38   :  { %112 = vst [vmem:[#allocation7 + $0x4] sm:$0x1] %v111_v4  ;;  %p132_p3 = scmp.lt.s32.totalorder %s356_s28, 0  ;;  %s133_s6 = ssub.s32 0, %s356_s28 }
  0x39   :  { %s584_s22 = smov (!%p355_p2, %s125_s22), %s582_s30  ;;  %s357_s7 = smin.u32 %s356_s28, %s133_s6 }
  0x3a   :  { %p149_p4 = scmp.lt.s32.totalorder %s510_s3, 0  ;;  %s135_s8 = sand.u32 63, %s357_s7  }
  0x3b   :  { %s127_s23 = scalar_lea.vmem [#allocation4], %s584_s22  ;;  %s136_s9 = ssub.s32 0, %s135_s8 }
  0x3c   :  { %v128_v5 = vld [vmem:[%s127_s23] sm:$0x1]  ;;  %s150_s10 = ssub.s32 0, %s510_s3  ;;  %s586_s9 = smov (!%p132_p3, %s136_s9), %s135_s8 }
  0x3d   :  { %129 = vst [vmem:[#allocation7 + $0x5] sm:$0x1] %v128_v5  ;;  %s361_s11 = smin.u32 %s510_s3, %s150_s10  ;;  %p166_p5 = scmp.lt.s32.totalorder %s514_s4, 0 }
  0x3e   :  { %p359_p6 = scmp.lt.s32.totalorder %s586_s9, 0  ;;  %s142_s12 = sadd.s32 64, %s586_s9 }
  0x3f   :  { %s152_s13 = sand.u32 63, %s361_s11   ;;  %s167_s14 = ssub.s32 0, %s514_s4 }
  0x40   :  { %s588_s12 = smov (!%p359_p6, %s142_s12), %s586_s9  ;;  %s153_s0 = ssub.s32 0, %s152_s13 }
  0x41   :  { %s365_s17 = smin.u32 %s514_s4, %s167_s14  ;;  %s144_s19 = scalar_lea.vmem [#allocation4], %s588_s12 }
  0x42   :  { %s169_s18 = sand.u32 63, %s365_s17   ;;  %v145_v6 = vld [vmem:[%s144_s19] sm:$0x1]  ;;  %s590_s0 = smov (!%p149_p4, %s153_s0), %s152_s13 }
  0x43   :  { %146 = vst [vmem:[#allocation7 + $0x6] sm:$0x1] %v145_v6  ;;  %s170_s20 = ssub.s32 0, %s169_s18  ;;  %p363_p7 = scmp.lt.s32.totalorder %s590_s0, 0 }
  0x44   :  { %s159_s25 = sadd.s32 64, %s590_s0  ;;  %s592_s20 = smov (!%p166_p5, %s170_s20), %s169_s18 }
  0x45   :  { %s594_s25 = smov (!%p363_p7, %s159_s25), %s590_s0  ;;  %p367_p8 = scmp.lt.s32.totalorder %s592_s20, 0 }
  0x46   :  { %s176_s1 = sadd.s32 64, %s592_s20  ;;  %s526_s26 = sld [smem:[#allocation3 + $0xa]] }
  0x47   :  { %s161_s27 = scalar_lea.vmem [#allocation4], %s594_s25  ;;  %s596_s1 = smov (!%p367_p8, %s176_s1), %s592_s20 }
  0x48   :  { %v162_v7 = vld [vmem:[%s161_s27] sm:$0x1]  ;;  %p183_p9 = scmp.lt.s32.totalorder %s368_s24, 0  ;;  %s184_s21 = ssub.s32 0, %s368_s24 }
  0x49   :  { %163 = vst [vmem:[#allocation7 + $0x7] sm:$0x1] %v162_v7  ;;  %s369_s28 = smin.u32 %s368_s24, %s184_s21  ;;  %s178_s29 = scalar_lea.vmem [#allocation4], %s596_s1 }
  0x4a   :  { %v179_v8 = vld [vmem:[%s178_s29] sm:$0x1]  ;;  %s186_s30 = sand.u32 63, %s369_s28   ;;  %s528_s3 = sld [smem:[#allocation3 + $0xb]] }
  0x4b   :  { %180 = vst [vmem:[#allocation7 + $0x8] sm:$0x1] %v179_v8  ;;  %s187_s4 = ssub.s32 0, %s186_s30  ;;  %s530_s5 = sld [smem:[#allocation3 + $0xc]] }
  0x4c   :  { %s598_s4 = smov (!%p183_p9, %s187_s4), %s186_s30  ;;  %p200_p10 = scmp.lt.s32.totalorder %s526_s26, 0 }
  0x4d   :  { %s201_s22 = ssub.s32 0, %s526_s26  ;;  %p371_p11 = scmp.lt.s32.totalorder %s598_s4, 0 }
  0x4e   :  { %s193_s6 = sadd.s32 64, %s598_s4  ;;  %s373_s7 = smin.u32 %s526_s26, %s201_s22 }
  0x4f   :  { %s535_s8 = sld [smem:[#allocation3 + $0xd]]  ;;  %s600_s6 = smov (!%p371_p11, %s193_s6), %s598_s4 }
  0x50   :  { %s203_s23 = sand.u32 63, %s373_s7   ;;  %p217_p12 = scmp.lt.s32.totalorder %s528_s3, 0 }
  0x51   :  { %s204_s9 = ssub.s32 0, %s203_s23  ;;  %s195_s10 = scalar_lea.vmem [#allocation4], %s600_s6 }
  0x52   :  { %v196_v9 = vld [vmem:[%s195_s10] sm:$0x1]  ;;  %s602_s9 = smov (!%p200_p10, %s204_s9), %s203_s23  ;;  %s218_s11 = ssub.s32 0, %s528_s3 }
  0x53   :  { %197 = vst [vmem:[#allocation7 + $0x9] sm:$0x1] %v196_v9  ;;  %p234_p13 = scmp.lt.s32.totalorder %s530_s5, 0  ;;  %p375_p0 = scmp.lt.s32.totalorder %s602_s9, 0 }
  0x54   :  { %s210_s12 = sadd.s32 64, %s602_s9  ;;  %s377_s13 = smin.u32 %s528_s3, %s218_s11 }
  0x55   :  { %s235_s14 = ssub.s32 0, %s530_s5  ;;  %s604_s12 = smov (!%p375_p0, %s210_s12), %s602_s9 }
  0x56   :  { %s220_s0 = sand.u32 63, %s377_s13   ;;  %s381_s17 = smin.u32 %s530_s5, %s235_s14 }
  0x57   :  { %s221_s18 = ssub.s32 0, %s220_s0  ;;  %s212_s19 = scalar_lea.vmem [#allocation4], %s604_s12 }
  0x58   :  { %v213_v10 = vld [vmem:[%s212_s19] sm:$0x1]  ;;  %s606_s18 = smov (!%p217_p12, %s221_s18), %s220_s0  ;;  %s237_s20 = sand.u32 63, %s381_s17  }
  0x59   :  { %214 = vst [vmem:[#allocation7 + $0xa] sm:$0x1] %v213_v10  ;;  %p251_p1 = scmp.lt.s32.totalorder %s535_s8, 0  ;;  %p379_p2 = scmp.lt.s32.totalorder %s606_s18, 0 }
  0x5a   :  { %s227_s24 = sadd.s32 64, %s606_s18  ;;  %s238_s25 = ssub.s32 0, %s237_s20 }
  0x5b   :  { %s252_s1 = ssub.s32 0, %s535_s8  ;;  %s608_s24 = smov (!%p379_p2, %s227_s24), %s606_s18 }
  0x5c   :  { %s610_s25 = smov (!%p234_p13, %s238_s25), %s237_s20  ;;  %s385_s26 = smin.u32 %s535_s8, %s252_s1 }
  0x5d   :  { %s229_s27 = scalar_lea.vmem [#allocation4], %s608_s24  ;;  %p383_p3 = scmp.lt.s32.totalorder %s610_s25, 0 }
  0x5e   :  { %v230_v11 = vld [vmem:[%s229_s27] sm:$0x1]  ;;  %s244_s21 = sadd.s32 64, %s610_s25  ;;  %s254_s28 = sand.u32 63, %s385_s26  }
  0x5f   :  { %231 = vst [vmem:[#allocation7 + $0xb] sm:$0x1] %v230_v11  ;;  %s388_s29 = sld [smem:[#allocation3 + $0xe]]  ;;  %s612_s21 = smov (!%p383_p3, %s244_s21), %s610_s25 }
  0x60   :  { %s255_s30 = ssub.s32 0, %s254_s28  ;;  %s392_s3 = sld [smem:[#allocation3 + $0xf]] }
  0x61   :  { %s246_s4 = scalar_lea.vmem [#allocation4], %s612_s21  ;;  %s614_s30 = smov (!%p251_p1, %s255_s30), %s254_s28 }
  0x62   :  { %v247_v12 = vld [vmem:[%s246_s4] sm:$0x1]  ;;  %p387_p4 = scmp.lt.s32.totalorder %s614_s30, 0  ;;  %s261_s22 = sadd.s32 64, %s614_s30 }
  0x63   :  { %248 = vst [vmem:[#allocation7 + $0xc] sm:$0x1] %v247_v12  ;;  %s459_s17 = smov [#allocation7]  }
  0x64   :  { %s616_s22 = smov (!%p387_p4, %s261_s22), %s614_s30  ;;  %s305_s18 = sshll.u32 %s459_s17, 4  ;;  %s306_s18 = int_to_ptr.vmem [resolvable:$true] %s305_s18 }
  0x65   :  { %p268_p5 = scmp.lt.s32.totalorder %s388_s29, 0  ;;  %s269_s5 = ssub.s32 0, %s388_s29 }
  0x66   :  { %s389_s6 = smin.u32 %s388_s29, %s269_s5  ;;  %s263_s23 = scalar_lea.vmem [#allocation4], %s616_s22 }
  0x67   :  { %s271_s7 = sand.u32 63, %s389_s6   ;;  %v264_v13 = vld [vmem:[%s263_s23] sm:$0x1]  ;;  %s286_s10 = ssub.s32 0, %s392_s3 }
  0x68   :  { %s272_s9 = ssub.s32 0, %s271_s7  ;;  %265 = vst [vmem:[#allocation7 + $0xd] sm:$0x1] %v264_v13  ;;  %s393_s11 = smin.u32 %s392_s3, %s286_s10 }
  0x69   :  { %s618_s9 = smov (!%p268_p5, %s272_s9), %s271_s7  ;;  %p285_p7 = scmp.lt.s32.totalorder %s392_s3, 0 }
  0x6a   :  { %p391_p6 = scmp.lt.s32.totalorder %s618_s9, 0  ;;  %s278_s12 = sadd.s32 64, %s618_s9 }
  0x6b   :  { %s288_s8 = sand.u32 63, %s393_s11   ;;  %s429_s20 = scalar_lea.vmem %s306_s18, 256 }
  0x6c   :  { %s620_s12 = smov (!%p391_p6, %s278_s12), %s618_s9  ;;  %s289_s13 = ssub.s32 0, %s288_s8 }
  0x6d   :  { %s280_s14 = scalar_lea.vmem [#allocation4], %s620_s12  ;;  %s622_s13 = smov (!%p285_p7, %s289_s13), %s288_s8 }
  0x6e   :  { %v281_v14 = vld [vmem:[%s280_s14] sm:$0x1]  ;;  %p395_p8 = scmp.lt.s32.totalorder %s622_s13, 0  ;;  %s295_s0 = sadd.s32 64, %s622_s13 }
  0x6f   :  { %282 = vst [vmem:[#allocation7 + $0xe] sm:$0x1] %v281_v14  ;;  %p430_p9 = scmp.ne.s32.totalorder %s306_s18, %s429_s20  ;;  %p434_p10 = scmp.lt.s32.totalorder %s306_s18, %s306_s18 }
  0x70   :  { %s624_s0 = smov (!%p395_p8, %s295_s0), %s622_s13  ;;  %p435_p11 = scmp.lt.s32.totalorder %s429_s20, %s429_s20 }
  0x71   :  { %s297_s19 = scalar_lea.vmem [#allocation4], %s624_s0 }
  0x72   :  { %v298_v15 = vld [vmem:[%s297_s19] sm:$0x1]  ;;  %p436_p12 = por %p435_p11, %p434_p10 }
  0x73   :  { %299 = vst [vmem:[#allocation7 + $0xf] sm:$0x1] %v298_v15 }
  0x74   :  { %p437_p13 = pnand %p436_p12, %p430_p9 }
  0x76   :  { %440 = shalt.err (!%p437_p13)
}
  0x77   :  { %311 = dma.vmem_to_hbm [thread:$0]  %s306_s18, 256, %s560_s2, [#allocation6], %s457_s15, %s457_s15, %s458_s16  }
  0x78   :  { %453 = dma.done.wait [#allocation6], 256  }
  0x79   :  { %454 = vsyncadd [#allocation6], 4294967040 }
  0x7a   :  { %315 = vsyncpa [#allocation5], 1 }
  0x7b   :  { %316 = vsyncpa [#allocation6], 1 }

</bundles_post_ra>
